<compile_context>
chip_gen: v7x
topology: tpu7x:2x2x1
jax: 0.10.0
libtpu: 0.0.40
codegen_flags: <defaults>
</compile_context>

<pallas_src>
import functools

import jax
import jax.numpy as jnp
from jax.experimental import pallas as pl
from jax.experimental.pallas import tpu as pltpu


# --------------------------------------------------------------------------- #
# Kernel
# --------------------------------------------------------------------------- #
def classifier_kernel(h_ref, w1_ref, b1_ref, w2_ref, b2_ref, wc_ref, bc_ref,
                      logits_ref, acc_ref, *, inv_seq_len):
    """Grid = (batch_tiles, seq_tiles); seq is the (arbitrary) reduction axis.

    h_ref      : [TB, TS, H]  streamed hidden-state tile (compute dtype)
    w*_ref     : pre-transposed [in, out] weights (compute dtype)
    b*_ref     : [1, out] biases (f32)
    logits_ref : [TB, Lpad] f32 output block (written on the last seq step)
    acc_ref    : [TB, H] f32 pooled-sum accumulator (VMEM scratch)
    """
    s = pl.program_id(1)

    @pl.when(s == 0)
    def _init():
        acc_ref[...] = jnp.zeros_like(acc_ref)

    # ---- seq-sum pooling as MXU matmuls (keeps the reduction off the XLU) --
    tb, ts, _ = h_ref.shape
    ones_row = jnp.ones((1, ts), dtype=h_ref.dtype)
    partial = jnp.concatenate(
        [jnp.dot(ones_row, h_ref[b], preferred_element_type=jnp.float32)
         for b in range(tb)],
        axis=0)                                            # [TB, H] f32
    acc_ref[...] += partial

    # ---- last seq step: mean + 3-layer MLP on the whole pooled batch tile --
    @pl.when(s == pl.num_programs(1) - 1)
    def _finish():
        cdt = w1_ref.dtype
        pooled = (acc_ref[...] * inv_seq_len).astype(cdt)  # [TB, H]

        x1 = jnp.dot(pooled, w1_ref[...], preferred_element_type=jnp.float32)
        x1 = jnp.maximum(x1 + b1_ref[...], 0.0)            # f32 elementwise

        x2 = jnp.dot(x1.astype(cdt), w2_ref[...],
                     preferred_element_type=jnp.float32)
        x2 = jnp.maximum(x2 + b2_ref[...], 0.0)

        logits = jnp.dot(x2.astype(cdt), wc_ref[...],
                         preferred_element_type=jnp.float32)
        logits_ref[...] = (logits + bc_ref[...]).astype(logits_ref.dtype)


# --------------------------------------------------------------------------- #
# One-time parameter prep (outside the hot path)
# --------------------------------------------------------------------------- #
def prepare_params(params, compute_dtype=jnp.bfloat16):
    """Transpose nn.Linear weights to [in, out], pad the class layer to a
    lane-dense multiple of 128, and cast weights to the streaming dtype.
    Biases stay f32 (added after f32 accumulation)."""
    H = params["w1"].shape[1]
    L = params["wc"].shape[0]
    Lp = ((L + 127) // 128) * 128

    wc_t = jnp.zeros((H, Lp), compute_dtype).at[:, :L].set(
        params["wc"].T.astype(compute_dtype))
    bc = jnp.zeros((1, Lp), jnp.float32).at[:, :L].set(
        params["bc"].astype(jnp.float32))

    return {
        "w1": params["w1"].T.astype(compute_dtype),
        "b1": params["b1"].reshape(1, H).astype(jnp.float32),
        "w2": params["w2"].T.astype(compute_dtype),
        "b2": params["b2"].reshape(1, H).astype(jnp.float32),
        "wc": wc_t,
        "bc": bc,
        "num_labels": int(L),
    }


# --------------------------------------------------------------------------- #
# Wrapper
# --------------------------------------------------------------------------- #
def bert_classifier_head(last_hidden_state, prepped, *, seq_tile=None,
                         compute_dtype=jnp.bfloat16):
    """last_hidden_state: [B, S, H].  Returns (logits [B, L] f32, pred [B])."""
    B, S, H = last_hidden_state.shape
    Lp = prepped["wc"].shape[1]
    L = prepped["num_labels"]

    # ---- tile selection -----------------------------------------------------
    itemsize = jnp.dtype(compute_dtype).itemsize
    sublane = {4: 8, 2: 16, 1: 32}.get(itemsize, 8)

    if seq_tile is None:
        seq_tile = min(S, 512)                 # big streamed tiles ~ HBM roofline
    seq_tile = min(seq_tile, S)
    if seq_tile != S:
        seq_tile = max(sublane, (seq_tile // sublane) * sublane)

    batch_tile = B if B <= 8 else 8            # single full-batch block if small

    # ---- pad: zero seq rows don't affect the sum; extra batch rows sliced off
    h = last_hidden_state.astype(compute_dtype)
    Sp = -(-S // seq_tile) * seq_tile
    Bp = -(-B // batch_tile) * batch_tile
    if Sp != S or Bp != B:
        h = jnp.pad(h, ((0, Bp - B), (0, Sp - S), (0, 0)))

    nb, ns = Bp // batch_tile, Sp // seq_tile

    # ---- VMEM budget (double-buffered stream + weights + output + scratch) --
    vmem_bytes = (
        2 * batch_tile * seq_tile * H * itemsize
        + 2 * ((2 * H * H + H * Lp) * itemsize + (2 * H + Lp) * 4)
        + 2 * batch_tile * Lp * 4
        + batch_tile * H * 4
        + (4 << 20)
    )
    vmem_bytes = int(min(max(vmem_bytes, 16 << 20), 64 << 20))

    kernel = functools.partial(classifier_kernel, inv_seq_len=1.0 / float(S))

    logits_padded = pl.pallas_call(
        kernel,
        out_shape=jax.ShapeDtypeStruct((Bp, Lp), jnp.float32),
        grid_spec=pltpu.PrefetchScalarGridSpec(
            num_scalar_prefetch=0,
            grid=(nb, ns),
            in_specs=[
                pl.BlockSpec((batch_tile, seq_tile, H), lambda b, s: (b, s, 0)),
                pl.BlockSpec((H, H), lambda b, s: (0, 0)),    # W1^T (resident)
                pl.BlockSpec((1, H), lambda b, s: (0, 0)),    # b1
                pl.BlockSpec((H, H), lambda b, s: (0, 0)),    # W2^T
                pl.BlockSpec((1, H), lambda b, s: (0, 0)),    # b2
                pl.BlockSpec((H, Lp), lambda b, s: (0, 0)),   # Wc^T (padded)
                pl.BlockSpec((1, Lp), lambda b, s: (0, 0)),   # bc  (padded)
            ],
            out_specs=pl.BlockSpec((batch_tile, Lp), lambda b, s: (b, 0)),
            scratch_shapes=[pltpu.VMEM((batch_tile, H), jnp.float32)],
        ),
        compiler_params=pltpu.CompilerParams(
            dimension_semantics=("parallel", "arbitrary"),
            vmem_limit_bytes=vmem_bytes,
        ),
    )(h, prepped["w1"], prepped["b1"], prepped["w2"], prepped["b2"],
      prepped["wc"], prepped["bc"])

    logits = logits_padded[:B, :L]
    pred = jnp.argmax(logits, axis=1)          # tiny; done in XLA per feedback
    return logits, pred


# --------------------------------------------------------------------------- #
# Reference + init
# --------------------------------------------------------------------------- #
def init_params(key, hidden_size, num_labels):
    ks = jax.random.split(key, 6)
    bound = 1.0 / jnp.sqrt(hidden_size)
    return {
        "w1": jax.random.uniform(ks[0], (hidden_size, hidden_size),
                                 jnp.float32, -bound, bound),
        "b1": jax.random.uniform(ks[1], (hidden_size,), jnp.float32, -bound, bound),
        "w2": jax.random.uniform(ks[2], (hidden_size, hidden_size),
                                 jnp.float32, -bound, bound),
        "b2": jax.random.uniform(ks[3], (hidden_size,), jnp.float32, -bound, bound),
        "wc": jax.random.uniform(ks[4], (num_labels, hidden_size),
                                 jnp.float32, -bound, bound),
        "bc": jax.random.uniform(ks[5], (num_labels,), jnp.float32, -bound, bound),
    }


def reference_forward(h, params, compute_dtype):
    """Pure-JAX reference mirroring the kernel's dtype policy."""
    cdt = compute_dtype
    pooled = jnp.mean(h.astype(cdt).astype(jnp.float32), axis=1)

    def lin(x, w, b):
        y = jnp.dot(x.astype(cdt), w.T.astype(cdt),
                    preferred_element_type=jnp.float32)
        return y + b.astype(jnp.float32)

    x1 = jnp.maximum(lin(pooled, params["w1"], params["b1"]), 0.0)
    x2 = jnp.maximum(lin(x1, params["w2"], params["b2"]), 0.0)
    logits = lin(x2, params["wc"], params["bc"])
    return logits, jnp.argmax(logits, axis=1)


# --------------------------------------------------------------------------- #
# Demo / self-check
# --------------------------------------------------------------------------- #
if __name__ == "__main__":
    B, S, H, L = 2, 32, 32, 4
    key = jax.random.PRNGKey(0)
    k_hidden, k_params = jax.random.split(key)

    # Synthetic stand-in for bert(...).last_hidden_state (external backbone).
    last_hidden_state = jax.random.normal(k_hidden, (B, S, H), jnp.float32)
    params = init_params(k_params, H, L)

    # --- fast path: bf16 streaming, f32 accumulation, 2 seq tiles -----------
    prepped_bf16 = prepare_params(params, compute_dtype=jnp.bfloat16)
    logits_bf16, pred_bf16 = bert_classifier_head(
        last_hidden_state, prepped_bf16, seq_tile=16, compute_dtype=jnp.bfloat16)
    jax.block_until_ready((logits_bf16, pred_bf16))

    ref_logits_bf16, ref_pred_bf16 = reference_forward(
        last_hidden_state, params, jnp.bfloat16)
    assert logits_bf16.shape == (B, L)
    assert jnp.allclose(logits_bf16, ref_logits_bf16, atol=1e-3, rtol=1e-2), \
        "bf16-path logits mismatch"
    assert jnp.array_equal(pred_bf16, ref_pred_bf16), "bf16-path pred mismatch"

    # --- full-precision path: tight numerical check --------------------------
    prepped_f32 = prepare_params(params, compute_dtype=jnp.float32)
    logits_f32, pred_f32 = bert_classifier_head(
        last_hidden_state, prepped_f32, seq_tile=16, compute_dtype=jnp.float32)
    jax.block_until_ready((logits_f32, pred_f32))

    ref_logits_f32, ref_pred_f32 = reference_forward(
        last_hidden_state, params, jnp.float32)
    assert jnp.allclose(logits_f32, ref_logits_f32, atol=1e-4, rtol=1e-4), \
        "f32-path logits mismatch"
    assert jnp.array_equal(pred_f32, ref_pred_f32), "f32-path pred mismatch"

    print("KERNEL_OK")
</pallas_src>

<mosaic_0001>
module attributes {stable_mosaic.version = 11 : i64} {
  func.func @classifier_kernel(%arg0: i32, %arg1: i32, %arg2: memref<2x16x32xbf16, #tpu.memory_space<vmem>>, %arg3: memref<32x32xbf16, #tpu.memory_space<vmem>>, %arg4: memref<1x32xf32, #tpu.memory_space<vmem>>, %arg5: memref<32x32xbf16, #tpu.memory_space<vmem>>, %arg6: memref<1x32xf32, #tpu.memory_space<vmem>>, %arg7: memref<32x128xbf16, #tpu.memory_space<vmem>>, %arg8: memref<1x128xf32, #tpu.memory_space<vmem>>, %arg9: memref<2x128xf32, #tpu.memory_space<vmem>>, %arg10: memref<2x32xf32, #tpu.memory_space<vmem>>) attributes {dimension_semantics = [#tpu.dimension_semantics<parallel>, #tpu.dimension_semantics<arbitrary>], iteration_bounds = array<i64: 1, 2>, scalar_prefetch = 0 : i64, scratch_operands = 1 : i64, tpu.core_type = #tpu.core_type<tc>, window_params = [{transform_indices = @transform_0, window_bounds = array<i64: 2, 16, 32>}, {pipeline_mode = #tpu.pipeline_mode<synchronous>, transform_indices = @transform_1, window_bounds = array<i64: 32, 32>}, {pipeline_mode = #tpu.pipeline_mode<synchronous>, transform_indices = @transform_2, window_bounds = array<i64: 1, 32>}, {pipeline_mode = #tpu.pipeline_mode<synchronous>, transform_indices = @transform_3, window_bounds = array<i64: 32, 32>}, {pipeline_mode = #tpu.pipeline_mode<synchronous>, transform_indices = @transform_4, window_bounds = array<i64: 1, 32>}, {pipeline_mode = #tpu.pipeline_mode<synchronous>, transform_indices = @transform_5, window_bounds = array<i64: 32, 128>}, {pipeline_mode = #tpu.pipeline_mode<synchronous>, transform_indices = @transform_6, window_bounds = array<i64: 1, 128>}, {transform_indices = @transform_7, window_bounds = array<i64: 2, 128>}]} {
    %c0_i32 = arith.constant 0 : i32
    %0 = arith.cmpi eq, %arg1, %c0_i32 : i32
    %1 = arith.extui %0 : i1 to i32
    %c0_i32_0 = arith.constant 0 : i32
    %2 = arith.cmpi ne, %1, %c0_i32_0 : i32
    scf.if %2 {
      %cst_12 = arith.constant 0.000000e+00 : f32
      %17 = vector.broadcast %cst_12 : f32 to vector<2x32xf32>
      %c0_13 = arith.constant 0 : index
      %c0_14 = arith.constant 0 : index
      %18 = vector.load %arg10[%c0_13, %c0_14] : memref<2x32xf32, #tpu.memory_space<vmem>>, vector<2x32xf32>
      tpu.vector_store %arg10[%c0_13, %c0_14], %17 {strides = array<i32>} : memref<2x32xf32, #tpu.memory_space<vmem>>, vector<2x32xf32>,
    } else {
    }
    %cst = arith.constant 1.000000e+00 : bf16
    %3 = vector.broadcast %cst : bf16 to vector<1x16xbf16>
    %c0 = arith.constant 0 : index
    %c0_1 = arith.constant 0 : index
    %c0_2 = arith.constant 0 : index
    %4 = vector.load %arg2[%c0, %c0_1, %c0_2] : memref<2x16x32xbf16, #tpu.memory_space<vmem>>, vector<1x16x32xbf16>
    %5 = vector.shape_cast %4 : vector<1x16x32xbf16> to vector<16x32xbf16>
    %cst_3 = arith.constant dense<0.000000e+00> : vector<1x32xf32>
    %6 = tpu.matmul %3, %5, %cst_3 {dimension_numbers = #tpu.dot_dimension_numbers<[1], [0], [0], [1], [0, 0, 1, 1], [], []>} : vector<1x16xbf16>, vector<16x32xbf16>, vector<1x32xf32> -> vector<1x32xf32>
    %c1 = arith.constant 1 : index
    %c0_4 = arith.constant 0 : index
    %c0_5 = arith.constant 0 : index
    %7 = vector.load %arg2[%c1, %c0_4, %c0_5] : memref<2x16x32xbf16, #tpu.memory_space<vmem>>, vector<1x16x32xbf16>
    %8 = vector.shape_cast %7 : vector<1x16x32xbf16> to vector<16x32xbf16>
    %cst_6 = arith.constant dense<0.000000e+00> : vector<1x32xf32>
    %9 = tpu.matmul %3, %8, %cst_6 {dimension_numbers = #tpu.dot_dimension_numbers<[1], [0], [0], [1], [0, 0, 1, 1], [], []>} : vector<1x16xbf16>, vector<16x32xbf16>, vector<1x32xf32> -> vector<1x32xf32>
    %10 = tpu.concatenate %6, %9 in 0 : vector<1x32xf32>, vector<1x32xf32> -> vector<2x32xf32>
    %c0_7 = arith.constant 0 : index
    %c0_8 = arith.constant 0 : index
    %11 = vector.load %arg10[%c0_7, %c0_8] : memref<2x32xf32, #tpu.memory_space<vmem>>, vector<2x32xf32>
    %12 = arith.addf %11, %10 : vector<2x32xf32>
    %c0_9 = arith.constant 0 : index
    %c0_10 = arith.constant 0 : index
    %13 = vector.load %arg10[%c0_9, %c0_10] : memref<2x32xf32, #tpu.memory_space<vmem>>, vector<2x32xf32>
    tpu.vector_store %arg10[%c0_9, %c0_10], %12 {strides = array<i32>} : memref<2x32xf32, #tpu.memory_space<vmem>>, vector<2x32xf32>,
    %c1_i32 = arith.constant 1 : i32
    %14 = arith.cmpi eq, %arg1, %c1_i32 : i32
    %15 = arith.extui %14 : i1 to i32
    %c0_i32_11 = arith.constant 0 : i32
    %16 = arith.cmpi ne, %15, %c0_i32_11 : i32
    scf.if %16 {
      %c0_12 = arith.constant 0 : index
      %c0_13 = arith.constant 0 : index
      %17 = vector.load %arg10[%c0_12, %c0_13] : memref<2x32xf32, #tpu.memory_space<vmem>>, vector<2x32xf32>
      %cst_14 = arith.constant 3.125000e-02 : f32
      %18 = vector.broadcast %cst_14 : f32 to vector<2x32xf32>
      %19 = arith.mulf %17, %18 : vector<2x32xf32>
      %20 = arith.truncf %19 : vector<2x32xf32> to vector<2x32xbf16>
      %c0_15 = arith.constant 0 : index
      %c0_16 = arith.constant 0 : index
      %21 = vector.load %arg3[%c0_15, %c0_16] : memref<32x32xbf16, #tpu.memory_space<vmem>>, vector<32x32xbf16>
      %cst_17 = arith.constant dense<0.000000e+00> : vector<2x32xf32>
      %22 = tpu.matmul %20, %21, %cst_17 {dimension_numbers = #tpu.dot_dimension_numbers<[1], [0], [0], [1], [0, 0, 1, 1], [], []>} : vector<2x32xbf16>, vector<32x32xbf16>, vector<2x32xf32> -> vector<2x32xf32>
      %c0_18 = arith.constant 0 : index
      %c0_19 = arith.constant 0 : index
      %23 = vector.load %arg4[%c0_18, %c0_19] : memref<1x32xf32, #tpu.memory_space<vmem>>, vector<1x32xf32>
      %24 = vector.broadcast %23 : vector<1x32xf32> to vector<2x32xf32>
      %25 = arith.addf %22, %24 : vector<2x32xf32>
      %cst_20 = arith.constant 0.000000e+00 : f32
      %26 = vector.broadcast %cst_20 : f32 to vector<2x32xf32>
      %27 = arith.maximumf %25, %26 : vector<2x32xf32>
      %28 = arith.truncf %27 : vector<2x32xf32> to vector<2x32xbf16>
      %c0_21 = arith.constant 0 : index
      %c0_22 = arith.constant 0 : index
      %29 = vector.load %arg5[%c0_21, %c0_22] : memref<32x32xbf16, #tpu.memory_space<vmem>>, vector<32x32xbf16>
      %cst_23 = arith.constant dense<0.000000e+00> : vector<2x32xf32>
      %30 = tpu.matmul %28, %29, %cst_23 {dimension_numbers = #tpu.dot_dimension_numbers<[1], [0], [0], [1], [0, 0, 1, 1], [], []>} : vector<2x32xbf16>, vector<32x32xbf16>, vector<2x32xf32> -> vector<2x32xf32>
      %c0_24 = arith.constant 0 : index
      %c0_25 = arith.constant 0 : index
      %31 = vector.load %arg6[%c0_24, %c0_25] : memref<1x32xf32, #tpu.memory_space<vmem>>, vector<1x32xf32>
      %32 = vector.broadcast %31 : vector<1x32xf32> to vector<2x32xf32>
      %33 = arith.addf %30, %32 : vector<2x32xf32>
      %cst_26 = arith.constant 0.000000e+00 : f32
      %34 = vector.broadcast %cst_26 : f32 to vector<2x32xf32>
      %35 = arith.maximumf %33, %34 : vector<2x32xf32>
      %36 = arith.truncf %35 : vector<2x32xf32> to vector<2x32xbf16>
      %c0_27 = arith.constant 0 : index
      %c0_28 = arith.constant 0 : index
      %37 = vector.load %arg7[%c0_27, %c0_28] : memref<32x128xbf16, #tpu.memory_space<vmem>>, vector<32x128xbf16>
      %cst_29 = arith.constant dense<0.000000e+00> : vector<2x128xf32>
      %38 = tpu.matmul %36, %37, %cst_29 {dimension_numbers = #tpu.dot_dimension_numbers<[1], [0], [0], [1], [0, 0, 1, 1], [], []>} : vector<2x32xbf16>, vector<32x128xbf16>, vector<2x128xf32> -> vector<2x128xf32>
      %c0_30 = arith.constant 0 : index
      %c0_31 = arith.constant 0 : index
      %39 = vector.load %arg8[%c0_30, %c0_31] : memref<1x128xf32, #tpu.memory_space<vmem>>, vector<1x128xf32>
      %40 = vector.broadcast %39 : vector<1x128xf32> to vector<2x128xf32>
      %41 = arith.addf %38, %40 : vector<2x128xf32>
      %c0_32 = arith.constant 0 : index
      %c0_33 = arith.constant 0 : index
      %42 = vector.load %arg9[%c0_32, %c0_33] : memref<2x128xf32, #tpu.memory_space<vmem>>, vector<2x128xf32>
      tpu.vector_store %arg9[%c0_32, %c0_33], %41 {strides = array<i32>} : memref<2x128xf32, #tpu.memory_space<vmem>>, vector<2x128xf32>,
    } else {
    }
    return
  }
  func.func @transform_0(%arg0: i32, %arg1: i32) -> (i32, i32, i32) {
    %c0_i32 = arith.constant 0 : i32
    %c0_i32_0 = arith.constant 0 : i32
    return %arg0, %arg1, %c0_i32 : i32, i32, i32
  }
  func.func @transform_1(%arg0: i32, %arg1: i32) -> (i32, i32) {
    %c0_i32 = arith.constant 0 : i32
    %c0_i32_0 = arith.constant 0 : i32
    %c0_i32_1 = arith.constant 0 : i32
    return %c0_i32, %c0_i32_0 : i32, i32
  }
  func.func @transform_2(%arg0: i32, %arg1: i32) -> (i32, i32) {
    %c0_i32 = arith.constant 0 : i32
    %c0_i32_0 = arith.constant 0 : i32
    %c0_i32_1 = arith.constant 0 : i32
    return %c0_i32, %c0_i32_0 : i32, i32
  }
  func.func @transform_3(%arg0: i32, %arg1: i32) -> (i32, i32) {
    %c0_i32 = arith.constant 0 : i32
    %c0_i32_0 = arith.constant 0 : i32
    %c0_i32_1 = arith.constant 0 : i32
    return %c0_i32, %c0_i32_0 : i32, i32
  }
  func.func @transform_4(%arg0: i32, %arg1: i32) -> (i32, i32) {
    %c0_i32 = arith.constant 0 : i32
    %c0_i32_0 = arith.constant 0 : i32
    %c0_i32_1 = arith.constant 0 : i32
    return %c0_i32, %c0_i32_0 : i32, i32
  }
  func.func @transform_5(%arg0: i32, %arg1: i32) -> (i32, i32) {
    %c0_i32 = arith.constant 0 : i32
    %c0_i32_0 = arith.constant 0 : i32
    %c0_i32_1 = arith.constant 0 : i32
    return %c0_i32, %c0_i32_0 : i32, i32
  }
  func.func @transform_6(%arg0: i32, %arg1: i32) -> (i32, i32) {
    %c0_i32 = arith.constant 0 : i32
    %c0_i32_0 = arith.constant 0 : i32
    %c0_i32_1 = arith.constant 0 : i32
    return %c0_i32, %c0_i32_0 : i32, i32
  }
  func.func @transform_7(%arg0: i32, %arg1: i32) -> (i32, i32) {
    %c0_i32 = arith.constant 0 : i32
    %c0_i32_0 = arith.constant 0 : i32
    return %arg0, %c0_i32 : i32, i32
  }
}

</mosaic_0001>

<bundles_post_ra>
// kernel: tpu_custom_call.1
= control target key start
LH: loop header
LB: loop body
LE: loop exit
PB: predicated region body
PF: predicated region fallthrough
CT: control target
= control target key end

     0   :  { %12 = vsyncpa [#allocation4], 0  ;;  %s1398_s0 = inlined_call_operand.hbm [shape: bf16[2,32,32], index: 0, kind: input, shape index: {}]   ;;  %s1399_s1 = inlined_call_operand.hbm [shape: bf16[32,32], index: 1, kind: input, shape index: {}]   ;;  %s1400_s2 = inlined_call_operand.vmem [shape: f32[1,32], index: 2, kind: input, shape index: {}]   ;;  %s1401_s3 = inlined_call_operand.hbm [shape: bf16[32,32], index: 3, kind: input, shape index: {}]   ;;  %s1402_s4 = inlined_call_operand.vmem [shape: f32[1,32], index: 4, kind: input, shape index: {}]   ;;  %s1403_s5 = inlined_call_operand.vmem [shape: bf16[32,128], index: 5, kind: input, shape index: {}]   ;;  %s1404_s6 = inlined_call_operand.vmem [shape: f32[1,128], index: 6, kind: input, shape index: {}]   ;;  %s1405_s7 = inlined_call_operand.hbm [shape: f32[2,128], index: 7, kind: output, shape index: {}]  }
   0x1   :  { %14 = vsyncpa [#allocation4 + $0x1], 0 }
   0x2   :  { %15 = vsyncpa [#allocation7], 0 }
   0x3   :  { %16 = vsyncpa [#allocation5], 0  ;;  %s1178_s24 = smov 0   ;;  %s1180_s25 = smov 0  }
   0x4   :  { %s1182_s26 = smov 0   ;;  %s1184_s27 = smov 0  }
   0x5   :  { %s1186_s28 = smov 0   ;;  %s1188_s29 = smov 0  }
   0x6 LB: > { %s1411_s30 = sadd.s32 4294967295, %s1119_s29   ;;  %s31_s8 = sadd.s32 1, %s1115_s28  ;;  %s1119_s29 = sphi %s1188_s29, %s22_s29   ;;  %s1115_s28 = sphi %s1186_s28, %s1432_s28   ;;  %s1111_s27 = sphi %s1184_s27, %s1431_s27   ;;  %s1107_s26 = sphi %s1182_s26, %s1430_s26   ;;  %s1103_s25 = sphi %s1180_s25, %s1429_s25   ;;  %s1099_s24 = sphi %s1178_s24, %s1428_s24  }
   0x7   : > { %p32_p0 = scmp.ge.s32.totalorder %s31_s8, 2  ;;  %s43_s9 = sadd.s32 1, %s1107_s26 }
   0x8   : > { %p50_p1 = scmp.ne.s32.totalorder %s1107_s26, %s1103_s25  ;;  %p51_p2 = scmp.eq.s32.totalorder %s1119_s29, 0 }
   0x9   : > { %s1434_s8 = smov (%p32_p0, %s31_s8), 0  ;;  %p56_p4 = scmp.ne.s32.totalorder %s1103_s25, %s1099_s24 }
   0xa   : > { %1413 = sst [smem:[#allocation16_spill]] %s1434_s8  ;;  %p1214_p3 = por %p51_p2, %p50_p1 }
   0xb   : > { %s39_s11 = ssub.s32 %s1115_s28, %s1434_s8  ;;  %p1223_p5 = scmp.eq.s32.totalorder %s1411_s30, 0 }
   0xc   : > { %s1414_s10 = scalar_select %p1214_p3, 1, 0 }
   0xd   : > { %s1415_s12 = scalar_select %p1223_p5, 1, 0 }
   0xe   : > { %p41_p6 = scmp.eq.s32.totalorder %s39_s11, 0  ;;  %p785_p7 = scmp.ge.s32.totalorder %s1119_s29, 1 }
   0xf   : > { %p1230_p8 = por %p1223_p5, %p56_p4  ;;  %p219_p9 = scmp.lt.s32.totalorder %s1119_s29, 3 }
  0x10   : > { %s1236_s14 = scalar_select %p41_p6, %s1107_s26, %s43_s9  }
  0x11   : > { %s1416_s13 = scalar_select %p1230_p8, 1, 0 }
  0x12   : > { %1417 = sst [smem:[#allocation17_spill]] %s1236_s14  ;;  %p1238_p10 = pnand %p785_p7, %p219_p9 }
  0x13   : > { %s1121_s16 = smov [#allocation6]   ;;  %s1122_s19 = smov [#allocation8]  }
  0x14   : > { %s1418_s15 = scalar_select %p1238_p10, 1, 0 }
  0x15   : > { %p893_p11 = pneg %p1238_p10  ;;  %s231_s17 = sshll.u32 %s1121_s16, 4  ;;  %s232_s17 = int_to_ptr.vmem [resolvable:$true] %s231_s17 }
  0x16   : > { %s247_s20 = sshll.u32 %s1122_s19, 4  ;;  %s979_s23 = scalar_lea.hbm %s1399_s1, 256  ;;  %s1250_s20 = int_to_ptr.vmem [resolvable:$true] %s247_s20 }
  0x17   : > { %p1246_p12 = pnand %p893_p11, %p1223_p5  ;;  %p980_p13 = scmp.ne.s32.totalorder %s1399_s1, %s979_s23 }
  0x18   : > { %p986_p4 = scmp.lt.u32.totalorder %s979_s23, %s1399_s1 }
  0x19   : > { %p981_p0 = pneg %p1246_p12 }
  0x1b   : > { %p982_p1 = pnand %p981_p0, %p980_p13 }
  0x1d   : > { %p983_p2 = pneg %p982_p1 }
  0x1f   : > { %p988_p6 = pnand %p986_p4, %p983_p2 }
  0x21   : > { %991 = shalt.err (!%p988_p6)
}
  0x22   : > { %s992_s19 = scalar_lea.vmem %s232_s17, 256  ;;  %p1000_p5 = scmp.lt.s32.totalorder %s232_s17, %s232_s17 }
  0x23   : > { %p993_p7 = scmp.ne.s32.totalorder %s232_s17, %s992_s19  ;;  %p1001_p8 = scmp.lt.s32.totalorder %s992_s19, %s992_s19 }
  0x25   : > { %p995_p9 = pnand %p993_p7, %p981_p0  ;;  %p1002_p10 = por %p1001_p8, %p1000_p5 }
  0x27   : > { %p996_p11 = pneg %p995_p9 }
  0x29   : > { %p1003_p3 = pnand %p1002_p10, %p996_p11 }
  0x2b   : > { %1006 = shalt.err (!%p1003_p3)
}
  0x2c   : > { %s1123_s21 = smov 64   ;;  %s1124_s22 = smov 4  }
  0x2d   : > { %896 = dma.hbm_to_vmem [thread:$0]  (!%p1246_p12), %s1399_s1, 256, %s232_s17, [#allocation7], %s1123_s21, %s1123_s21, %s1124_s22  }
  0x2e   : > { %s1007_s16 = scalar_lea.hbm %s1401_s3, 256 }
  0x2f   : > { %p1008_p13 = scmp.ne.s32.totalorder %s1401_s3, %s1007_s16  ;;  %p1014_p8 = scmp.lt.u32.totalorder %s1007_s16, %s1401_s3 }
  0x31   : > { %p1010_p3 = pnand %p1008_p13, %p981_p0 }
  0x33   : > { %p1011_p5 = pneg %p1010_p3 }
  0x35   : > { %p1016_p10 = pnand %p1014_p8, %p1011_p5 }
  0x37   : > { %1019 = shalt.err (!%p1016_p10)
}
  0x38   : > { %s1020_s17 = scalar_lea.vmem %s1250_s20, 256  ;;  %p1028_p6 = scmp.lt.s32.totalorder %s1250_s20, %s1250_s20 }
  0x39   : > { %p1021_p1 = scmp.ne.s32.totalorder %s1250_s20, %s1020_s17  ;;  %p1029_p7 = scmp.lt.s32.totalorder %s1020_s17, %s1020_s17 }
  0x3b   : > { %p1023_p2 = pnand %p1021_p1, %p981_p0  ;;  %p1030_p9 = por %p1029_p7, %p1028_p6 }
  0x3d   : > { %p1024_p4 = pneg %p1023_p2 }
  0x3f   : > { %p1031_p11 = pnand %p1030_p9, %p1024_p4 }
  0x41   : > { %1034 = shalt.err (!%p1031_p11)
}
  0x42   : > { %899 = dma.hbm_to_vmem [thread:$0]  (!%p1246_p12), %s1401_s3, 256, %s1250_s20, [#allocation7], %s1123_s21, %s1123_s21, %s1124_s22  }
  0x43   : > { %p788_p13 = scmp.ge.s32.totalorder %s1119_s29, 2 }
  0x45   : > { %266 = sbr.rel (%p788_p13) target bundleno = 91 (0x5b), region = 40 }
  0x4c   : > { %s270_s14 = sand.u32 1, %s1107_s26   ;;  %s822_s23 = sshll.u32 %s1115_s28, 7 }
  0x4d   : > { %s789_s24 = sshll.u32 %s270_s14, 4  ;;  %s283_s11 = scalar_lea.hbm %s1398_s0, %s822_s23 }
  0x4e   : > { %p1420_p0 = scmp.ne.s32.totalorder %s1414_s10, 0  ;;  %s274_s21 = scalar_lea.vmem [#allocation3], %s789_s24 }
  0x4f   : > { %s296_s22 = sshll.u32 %s274_s21, 4  ;;  %s1125_s19 = smov 256   ;;  %s297_s22 = int_to_ptr.vmem [resolvable:$true] %s296_s22 }
  0x50   : > { %s876_s20 = scalar_select %p1420_p0, [#allocation0], [#allocation12] }
  0x51   : > { %877 = sst [smem:[#allocation11]] (%p1420_p0), %s1125_s19  ;;  %s1126_s17 = smov 128  }
  0x52   : > { %s288_s16 = sld [smem:[%s876_s20]]   ;;  %s1127_s30 = smov 2  }
  0x53   : > { %878 = sst [smem:[#allocation11 + $0x1]] (%p1420_p0), %s1126_s17  ;;  %s1128_s8 = smov 64  }
  0x54   : > { %879 = sst [smem:[#allocation11 + $0x2]] (%p1420_p0), %s1127_s30  ;;  %s1129_s24 = smov 4  }
  0x55   : > { %880 = sst [smem:[#allocation11 + $0x3]] (%p1420_p0), %s1128_s8  ;;  %s271_s9 = scalar_lea.sflag [#allocation4], %s270_s14 }
  0x56   : > { %881 = sst [smem:[#allocation11 + $0x4]] (%p1420_p0), %s1128_s8  ;;  %s1130_s20 = smov [#allocation10]  }
  0x57   : > { %882 = sst [smem:[#allocation11 + $0x5]] (%p1420_p0), %s1129_s24 }
  0x58   : > { %s792_s23 = sshll.u32 %s288_s16, 26 }
  0x59   : > { %s793_s18 = sadd.s32 134217728, %s792_s23 }
  0x5a   : > { %883 = dma.general (%p1420_p0), %s283_s11, 256, %s297_s22, %s271_s9, %s1130_s20, [#allocation11], %s793_s18, 0  }
  0x5b PF: > { %p1421_p12 = scmp.ne.s32.totalorder %s1418_s15, 0 }
  0x5c   : > { %s323_s21 = sand.u32 (!%p1421_p12), 1, %s1103_s25   ;;  %p1422_p3 = scmp.ne.s32.totalorder (!%p1421_p12), %s1416_s13, 0 }
  0x5d   : > { %321 = sbr.rel (%p1421_p12) target bundleno = 1024 (0x400), region = 48  ;;  %s795_s19 = sshll.u32 (!%p1421_p12), %s323_s21, 4 }
  0x5e   : > { %s324_s17 = scalar_lea.sflag (!%p1421_p12), [#allocation4], %s323_s21  ;;  %s327_s30 = scalar_lea.vmem (!%p1421_p12), [#allocation3], %s795_s19 }
  0x64   : > { %1086 = dma.done.wait (%p1422_p3), %s324_s17, 256  }
  0x65   : > { %1088 = vsyncadd (%p1422_p3), %s324_s17, 4294967040  ;;  %p1423_p5 = scmp.ne.s32.totalorder %s1415_s12, 0 }
  0x67   : > { %1090 = dma.done.wait (%p1423_p5), [#allocation7], 512  }
  0x68   : > { %1092 = vsyncadd (%p1423_p5), [#allocation7], 4294966784  ;;  %p798_p8 = scmp.ne.s32.totalorder %s1111_s27, 0 }
  0x69   : > { %vm369_vm0 = vcmask (!%p798_p8), 254976   ;;  %v1131_v0 = vmov (!%p798_p8), 0.0  }
  0x6a   : > { %368 = sbr.rel (%p798_p8) target bundleno = 113 (0x71), region = 64  ;;  %370 = vst.msk [vmem:[#allocation2] sm:$0x3] (!%p798_p8), %vm369_vm0, %v1131_v0 }
  0x71 PF: > { %v971_v1 = vld [vmem:[%s327_s30] sm:$0xff]   ;;  %v1132_v2 = vmov 0.0   ;;  %v972_v3 = vld [vmem:[%s327_s30 + $0x8] sm:$0xff]   ;;  %vm1133_vm1 = vmmov 0   ;;  %vm379_vm2 = vcmask 130048   ;;  %vm475_vm3 = vcmask 1040384  }
  0x72   : > { %836 = vmatprep.subr.bf16.mxu0 %v1132_v2  ;;  %842 = vmatprep.subr.bf16.mxu1 %v1132_v2  ;;  %v1134_v4 = vmov 1065369472   ;;  %v477_v9 = vld [vmem:[#allocation2] sm:$0x3]  ;;  %vm479_vm4 = vcmask 254976   ;;  %p805_p10 = scmp.ne.s32.totalorder %s1111_s27, 1 }
  0x73   : > { %837 = vmatpush3.bf16.msra.mxu0 %v971_v1  ;;  %838 = vmatprep.mubr.msk.bf16.mxu0 %vm1133_vm1, %v1132_v2  ;;  %v973_v17 = vld [vmem:[#allocation6] sm:$0xff] (!%p805_p10)   ;;  %v1135_v18 = vmov (!%p805_p10), 0.0   ;;  %v974_v19 = vld [vmem:[#allocation6 + $0x8] sm:$0xff] (!%p805_p10)   ;;  %vm1136_vm5 = vmmov (!%p805_p10), 0   ;;  %vm511_vm6 = vcmask (!%p805_p10), 261120   ;;  %v975_v23 = vld [vmem:[#allocation8] sm:$0xff] (!%p805_p10)  }
  0x74   : > { %843 = vmatpush3.bf16.msra.mxu1 %v972_v3  ;;  %844 = vmatprep.mubr.msk.bf16.mxu1 %vm1133_vm1, %v1132_v2  ;;  %v976_v24 = vld [vmem:[#allocation8 + $0x8] sm:$0xff] (!%p805_p10)   ;;  %v978_v34 = vld [vmem:[%s1403_s5 + $0x8] sm:$0xff] (!%p805_p10)  }
  0x75   : > { %848 = vmatprep.subr.bf16.mxu0 (!%p805_p10), %v1135_v18  ;;  %856 = vmatprep.subr.bf16.mxu1 (!%p805_p10), %v1135_v18  ;;  %v977_v25 = vld [vmem:[%s1403_s5] sm:$0xff] (!%p805_p10)  }
  0x76   : > { %839 = vmatmul.mubr.msk.bf16.vlgmr.msra.gmra.mrb[0].mxu0 %vm379_vm2, %v1134_v4  ;;  %v806_v26 = vld [vmem:[%s1400_s2] ss:$0 sm:$0xff] (!%p805_p10) }
  0x77   : > { %845 = vmatmul.mubr.msk.bf16.vlgmr.msra.gmra.mrb[0].mxu1 %vm379_vm2, %v1134_v4  ;;  %849 = vmatpush3.bf16.msra.mxu0 (!%p805_p10), %v973_v17  ;;  %v810_v35 = vld [vmem:[%s1402_s4] ss:$0 sm:$0xff] (!%p805_p10) }
  0x78   : > { %852 = vmatprep.mubr.msk.bf16.mxu0 (!%p805_p10), %vm1136_vm5, %v1135_v18  ;;  %850 = vmatprep.subr.bf16.mxu0 (!%p805_p10), %v1135_v18  ;;  %v814_v43 = vld [vmem:[%s1404_s6] ss:$0 sm:$0xff] (!%p805_p10) }
  0x79   : > { %860 = vmatprep.mubr.msk.bf16.mxu1 (!%p805_p10), %vm1136_vm5, %v1135_v18  ;;  %857 = vmatpush3.bf16.msra.mxu1 (!%p805_p10), %v975_v23 }
  0x7a   : > { %858 = vmatprep.subr.bf16.mxu1 (!%p805_p10), %v1135_v18 }
  0x7b   : > { %851 = vmatpush3.bf16.msra.mxu0 (!%p805_p10), %v974_v19 }
  0x7c   : > { %864 = vmatprep.subr.bf16.mxu0 (!%p805_p10), %v1135_v18 }
  0x7d   : > { %859 = vmatpush3.bf16.msra.mxu1 (!%p805_p10), %v976_v24 }
 0x149   : > { %v417_v5 = vpop.f32.mrb[0].mxu0 }
 0x14a   : > { %v466_v6 = vpop.f32.mrb[0].mxu1  ;;  %v840_v7 = vpop.f32.mrb[1].mxu0  ;;  %484 = sbr.rel (%p805_p10) target bundleno = 999 (0x3e7), region = 68 }
 0x14b   : > { %v473_v8 = vrot.slane %v466_v6, 7  ;;  %v846_v10 = vpop.f32.mrb[1].mxu1  ;;  %v420_v11 = vpop.f32.mrb[2].mxu0 }
 0x14c   : > { %v469_v12 = vpop.f32.mrb[2].mxu1  ;;  %v841_v13 = vpop.f32.mrb[3].mxu0 }
 0x14d   : > { %v476_v14 = vsel %vm475_vm3, %v417_v5, %v473_v8  ;;  %v847_v15 = vpop.f32.mrb[3].mxu1 }
 0x14e   : > { %v478_v16 = vadd.f32 %v477_v9, %v476_v14 }
 0x150   : > { %480 = vst.msk [vmem:[#allocation2] sm:$0x3] %vm479_vm4, %v478_v16 }
 0x157   : > { %v485_v20 = vld [vmem:[#allocation2] sm:$0x3] }
 0x158   : > { %v486_v21 = vmul.f32 0.03125, %v485_v20 }
 0x15a   : > { %v487_v22 = vpack.c.bf16 %v486_v21, %v486_v21 }
 0x15c   : > { %853 = vmatmul.mubr.msk.bf16.vlgmr.msra.gmra.mrb[0].mxu0 %vm511_vm6, %v487_v22 }
 0x15d   : > { %868 = vmatprep.mubr.msk.bf16.mxu0 %vm1136_vm5, %v1135_v18  ;;  %865 = vmatpush3.bf16.msra.mxu0 %v977_v25 }
 0x15e   : > { %866 = vmatprep.subr.bf16.mxu0 %v1135_v18 }
 0x161   : > { %867 = vmatpush3.bf16.msra.mxu0 %v978_v34 }
 0x22f   : > { %v549_v27 = vpop.f32.mrb[0].mxu0 }
 0x230   : > { %v550_v28 = vadd.f32 %v806_v26, %v549_v27  ;;  %v854_v29 = vpop.f32.mrb[1].mxu0 }
 0x231   : > { %v552_v30 = vpop.f32.mrb[2].mxu0 }
 0x232   : > { %v555_v31 = vmax.f32 %v550_v28, 0.0  ;;  %v855_v32 = vpop.f32.mrb[3].mxu0 }
 0x234   : > { %v556_v33 = vpack.c.bf16 %v555_v31, %v555_v31 }
 0x236   : > { %861 = vmatmul.mubr.msk.bf16.vlgmr.msra.gmra.mrb[0].mxu1 %vm511_vm6, %v556_v33 }
 0x309   : > { %v617_v36 = vpop.f32.mrb[0].mxu1 }
 0x30a   : > { %v618_v37 = vadd.f32 %v810_v35, %v617_v36  ;;  %v862_v38 = vpop.f32.mrb[1].mxu1 }
 0x30b   : > { %v620_v39 = vpop.f32.mrb[2].mxu1 }
 0x30c   : > { %v623_v40 = vmax.f32 %v618_v37, 0.0  ;;  %v863_v41 = vpop.f32.mrb[3].mxu1 }
 0x30e   : > { %v624_v42 = vpack.c.bf16 %v623_v40, %v623_v40 }
 0x310   : > { %869 = vmatmul.mubr.msk.bf16.vlgmr.msra.gmra.mrb[4].mxu0 %vm511_vm6, %v624_v42 }
 0x3e3   : > { %v685_v44 = vpop.f32.mrb[4].mxu0 }
 0x3e4   : > { %v686_v45 = vadd.f32 %v814_v43, %v685_v44  ;;  %v870_v46 = vpop.f32.mrb[5].mxu0 }
 0x3e5   : > { %v688_v47 = vpop.f32.mrb[6].mxu0 }
 0x3e6   : > { %691 = vst [vmem:[#allocation9] sm:$0x3] %v686_v45  ;;  %v871_v48 = vpop.f32.mrb[7].mxu0 }
 0x3e7 PF: > { %s1424_s23 = sadd.s32 4294967295, %s1119_s29   ;;  %s1137_s18 = smov [#allocation9]  }
 0x3e8   : > { %p1354_p1 = scmp.eq.s32.totalorder %s1424_s23, 1  ;;  %s701_s9 = sshll.u32 %s1137_s18, 4  ;;  %s702_s9 = int_to_ptr.vmem [resolvable:$true] %s701_s9 }
 0x3e9   : > { %s1035_s20 = scalar_lea.vmem %s702_s9, 32  ;;  %p1042_p7 = scmp.lt.s32.totalorder %s702_s9, %s702_s9 }
 0x3ea   : > { %p1036_p2 = scmp.ne.s32.totalorder %s702_s9, %s1035_s20  ;;  %p1043_p9 = scmp.lt.s32.totalorder %s1035_s20, %s1035_s20 }
 0x3ec   : > { %p1037_p4 = pnand %p1036_p2, %p1354_p1  ;;  %p1044_p11 = por %p1043_p9, %p1042_p7 }
 0x3ee   : > { %p1038_p6 = pneg %p1037_p4 }
 0x3f0   : > { %p1045_p13 = pnand %p1044_p11, %p1038_p6 }
 0x3f2   : > { %1048 = shalt.err (!%p1045_p13)
}
 0x3f3   : > { %s1049_s17 = scalar_lea.hbm %s1405_s7, 32 }
 0x3f4   : > { %p1050_p0 = scmp.ne.s32.totalorder %s1405_s7, %s1049_s17  ;;  %p1055_p5 = scmp.lt.u32.totalorder %s1049_s17, %s1405_s7 }
 0x3f6   : > { %p1051_p12 = pnand %p1050_p0, %p1354_p1 }
 0x3f8   : > { %p1052_p3 = pneg %p1051_p12 }
 0x3fa   : > { %p1057_p8 = pnand %p1055_p5, %p1052_p3 }
 0x3fc   : > { %1060 = shalt.err (!%p1057_p8)
}
 0x3fd   : > { %890 = dma.vmem_to_hbm [thread:$0]  (%p1354_p1), %s702_s9, 32, %s1405_s7, [#allocation5]  }
 0x3fe   : > { %1094 = dma.done.wait (%p1354_p1), [#allocation5], 32  }
 0x3ff   : > { %1096 = vsyncadd (%p1354_p1), [#allocation5], 4294967264 }
 0x400 PF: > { %s22_s29 = sadd.s32 1, %s1119_s29   ;;  %s1426_s14 = sld [smem:[#allocation17_spill]] }
 0x401   : > { %p19_p10 = scmp.ge.s32.totalorder %s22_s29, 4   ;;  %s1427_s11 = sld [smem:[#allocation16_spill]] }
 0x402   : > { %s1428_s24 = smov %s1103_s25  ;;  %s1429_s25 = smov %s1107_s26 }
 0x403   : > { %s1431_s27 = smov %s1115_s28  ;;  %21 = sbr.rel (!%p19_p10) target bundleno = 6 (0x6), region = 108 }
 0x406   : > { %s1430_s26 = smov %s1426_s14 }
 0x407   : > { %s1432_s28 = smov %s1427_s11 }
 0x40a   :  { %714 = vsyncpa [#allocation4], 1 }
 0x40b   :  { %716 = vsyncpa [#allocation4 + $0x1], 1 }
 0x40c   :  { %717 = vsyncpa [#allocation7], 1 }
 0x40d   :  { %718 = vsyncpa [#allocation5], 1 }
 0x40e   :  { %720 = vsyncpa [#allocation5 + $0x1], 1 }

</bundles_post_ra>
